<compile_context>
chip_gen: v7x
topology: tpu7x:2x2x1
jax: 0.10.0
libtpu: 0.0.40
codegen_flags: <defaults>
</compile_context>

<pallas_src>
import jax
import jax.numpy as jnp
from jax.experimental import pallas as pl
from jax.experimental.pallas import tpu as pltpu


def _round_up(n: int, m: int) -> int:
    return ((n + m - 1) // m) * m


def _pick_time_tile(t_padded: int) -> int:
    """Largest lane-dense tile (multiple of 128) dividing T, capped at 1024 for v7x VMEM."""
    for tt in (1024, 512, 256, 128):
        if tt <= t_padded and t_padded % tt == 0:
            return tt
    return t_padded  # unreachable: t_padded is always a multiple of 128


def _subject_block_kernel(idx_ref, x_ref, wc_ref, bc_ref, o_ref):
    # idx_ref : (B,) int32 scalar-prefetch ref in SMEM (used only by the index_maps)
    # x_ref   : (1, Cp, tT)  bf16 input time-tile for batch b
    # wc_ref  : (1, Dp, Cp)  bf16 fused per-subject weight  W_subj[idx[b]] @ W1
    # bc_ref  : (1, Dp, 1)   f32  fused per-subject bias    W_subj[idx[b]] @ b1
    # o_ref   : (1, Dp, tT)  f32  output time-tile
    del idx_ref
    acc = jnp.dot(wc_ref[0], x_ref[0], preferred_element_type=jnp.float32)
    o_ref[0] = (acc + bc_ref[0]).astype(o_ref.dtype)


def _subject_block_pallas(x, subject_idxs, w1, b1, w_subj):
    B, C_in, T = x.shape
    S, D1, _ = w_subj.shape
    out_dtype = jnp.promote_types(x.dtype, w1.dtype)  # f32 for f32 params (matches torch)

    # ---- Algebraic fusion of the two 1x1 convs (computed once, outside the kernel) ----
    w1_f = w1.astype(jnp.float32)
    b1_f = b1.astype(jnp.float32)
    ws_f = w_subj.astype(jnp.float32)
    w_comb = jnp.einsum("sde,ec->sdc", ws_f, w1_f)      # (S, D1, C_in)
    b_comb = jnp.einsum("sde,e->sd", ws_f, b1_f)        # (S, D1)

    # ---- Padding: channels to bf16 sublane multiples, time to lane multiples ----
    Cp = _round_up(max(C_in, 16), 16)
    Dp = _round_up(max(D1, 16), 16)
    Tp = _round_up(max(T, 128), 128)

    x_p = x.astype(jnp.bfloat16)
    if (Cp, Tp) != (C_in, T):
        x_p = jnp.pad(x_p, ((0, 0), (0, Cp - C_in), (0, Tp - T)))

    w_comb_p = w_comb
    if (Dp, Cp) != (D1, C_in):
        w_comb_p = jnp.pad(w_comb, ((0, 0), (0, Dp - D1), (0, Cp - C_in)))
    w_comb_p = w_comb_p.astype(jnp.bfloat16)

    b_comb_p = b_comb
    if Dp != D1:
        b_comb_p = jnp.pad(b_comb, ((0, 0), (0, Dp - D1)))
    b_comb_p = b_comb_p.reshape(S, Dp, 1).astype(jnp.float32)

    idxs = subject_idxs.astype(jnp.int32)

    tT = _pick_time_tile(Tp)
    grid = (B, Tp // tT)

    def run(extra_buffering: bool):
        def stream_spec(block_shape, index_map):
            # Streamed (x / out) blocks: request a 3-deep pipeline; per-tile compute
            # is tiny so the pipeline is DMA-bound and a third buffer hides jitter.
            if extra_buffering:
                return pl.BlockSpec(block_shape, index_map,
                                    pipeline_mode=pl.Buffered(3))
            return pl.BlockSpec(block_shape, index_map)

        return pl.pallas_call(
            _subject_block_kernel,
            out_shape=jax.ShapeDtypeStruct((B, Dp, Tp), out_dtype),
            grid_spec=pltpu.PrefetchScalarGridSpec(
                num_scalar_prefetch=1,            # subject_idxs -> SMEM
                grid=grid,
                in_specs=[
                    # streamed input time-tile for batch b
                    stream_spec((1, Cp, tT), lambda b, t, idx: (b, 0, t)),
                    # fused per-subject weight / bias: block index only depends on b,
                    # so they stay resident across all T tiles of one batch element
                    pl.BlockSpec((1, Dp, Cp), lambda b, t, idx: (idx[b], 0, 0)),
                    pl.BlockSpec((1, Dp, 1), lambda b, t, idx: (idx[b], 0, 0)),
                ],
                out_specs=stream_spec((1, Dp, tT), lambda b, t, idx: (b, 0, t)),
            ),
            compiler_params=pltpu.CompilerParams(
                dimension_semantics=("parallel", "parallel"),
            ),
        )(idxs, x_p, w_comb_p, b_comb_p)

    try:
        out = run(True)
    except Exception:  # pipeline_mode / pl.Buffered unsupported -> default 2-deep pipeline
        out = run(False)

    if (Dp, Tp) != (D1, T):
        out = out[:, :D1, :T]
    return out


def subject_block_forward(x, subject_idxs, w_raw, b_raw, w_mid, b_mid, w_subj,
                          *, num_channels):
    """Mirrors SubjectBlock.forward. The branch on X.shape[1] is static in JAX."""
    if x.shape[1] == num_channels:
        w1, b1 = w_raw, b_raw
    else:
        w1, b1 = w_mid, b_mid
    return _subject_block_pallas(x, subject_idxs, w1, b1, w_subj)


def _reference(x, subject_idxs, w1, b1, w_subj):
    mid = jnp.einsum("dc,bct->bdt", w1, x) + b1[None, :, None]
    ws = w_subj[subject_idxs]                     # (B, D1, D1)
    return jnp.einsum("bde,bet->bdt", ws, mid)


if __name__ == "__main__":
    key = jax.random.PRNGKey(0)
    B, S, C, D1, T = 2, 3, 8, 16, 128
    ks = jax.random.split(key, 12)

    x_raw = jax.random.normal(ks[0], (B, C, T), dtype=jnp.float32)
    x_mid = jax.random.normal(ks[1], (B, D1, T), dtype=jnp.float32)
    w_raw = jax.random.normal(ks[2], (D1, C), dtype=jnp.float32) * 0.1
    b_raw = jax.random.normal(ks[3], (D1,), dtype=jnp.float32) * 0.1
    w_mid = jax.random.normal(ks[4], (D1, D1), dtype=jnp.float32) * 0.1
    b_mid = jax.random.normal(ks[5], (D1,), dtype=jnp.float32) * 0.1
    w_subj = jax.random.normal(ks[6], (S, D1, D1), dtype=jnp.float32) * 0.1
    subject_idxs = jnp.array([2, 0], dtype=jnp.int32)

    tol = 2e-2  # bf16 inputs/weights, f32 accumulation + fused-weight reordering

    # Branch 1: raw-channel input (C == num_channels) -> conv_raw path.
    out1 = jax.block_until_ready(
        subject_block_forward(x_raw, subject_idxs, w_raw, b_raw, w_mid, b_mid,
                              w_subj, num_channels=C))
    ref1 = _reference(x_raw, subject_idxs, w_raw, b_raw, w_subj)
    assert out1.shape == (B, D1, T)
    assert float(jnp.max(jnp.abs(out1 - ref1))) < tol, "conv_raw branch mismatch"

    # Branch 2: D1-channel input -> conv path.
    out2 = jax.block_until_ready(
        subject_block_forward(x_mid, subject_idxs, w_raw, b_raw, w_mid, b_mid,
                              w_subj, num_channels=C))
    ref2 = _reference(x_mid, subject_idxs, w_mid, b_mid, w_subj)
    assert out2.shape == (B, D1, T)
    assert float(jnp.max(jnp.abs(out2 - ref2))) < tol, "conv branch mismatch"

    # Branch 3: awkward C / D1 / T exercise the padding paths (no full-T fallback).
    C2, D2, T2 = 10, 20, 100
    x3 = jax.random.normal(ks[7], (B, C2, T2), dtype=jnp.float32)
    w_raw3 = jax.random.normal(ks[8], (D2, C2), dtype=jnp.float32) * 0.1
    b_raw3 = jax.random.normal(ks[9], (D2,), dtype=jnp.float32) * 0.1
    w_mid3 = jax.random.normal(ks[10], (D2, D2), dtype=jnp.float32) * 0.1
    b_mid3 = jax.random.normal(ks[11], (D2,), dtype=jnp.float32) * 0.1
    w_subj3 = jax.random.normal(ks[6], (S, D2, D2), dtype=jnp.float32) * 0.1
    out3 = jax.block_until_ready(
        subject_block_forward(x3, subject_idxs, w_raw3, b_raw3, w_mid3, b_mid3,
                              w_subj3, num_channels=C2))
    ref3 = _reference(x3, subject_idxs, w_raw3, b_raw3, w_subj3)
    assert out3.shape == (B, D2, T2)
    assert float(jnp.max(jnp.abs(out3 - ref3))) < tol, "padded-shape branch mismatch"

    print("KERNEL_OK")
</pallas_src>

<mosaic_0001>
module attributes {stable_mosaic.version = 11 : i64} {
  func.func @_subject_block_kernel(%arg0: i32, %arg1: i32, %arg2: memref<2xi32, #tpu.memory_space<smem>>, %arg3: memref<1x16x128xbf16, #tpu.memory_space<vmem>>, %arg4: memref<1x16x16xbf16, #tpu.memory_space<vmem>>, %arg5: memref<1x16x1xf32, #tpu.memory_space<vmem>>, %arg6: memref<1x16x128xf32, #tpu.memory_space<vmem>>) attributes {dimension_semantics = [#tpu.dimension_semantics<parallel>, #tpu.dimension_semantics<parallel>], iteration_bounds = array<i64: 2, 1>, scalar_prefetch = 1 : i64, scratch_operands = 0 : i64, tpu.core_type = #tpu.core_type<tc>, window_params = [{transform_indices = @transform_0, window_bounds = array<i64: 1, 16, 128>}, {transform_indices = @transform_1, window_bounds = array<i64: 1, 16, 16>}, {transform_indices = @transform_2, window_bounds = array<i64: 1, 16, 1>}, {transform_indices = @transform_3, window_bounds = array<i64: 1, 16, 128>}]} {
    %c0 = arith.constant 0 : index
    %c0_0 = arith.constant 0 : index
    %c0_1 = arith.constant 0 : index
    %0 = vector.load %arg4[%c0, %c0_0, %c0_1] : memref<1x16x16xbf16, #tpu.memory_space<vmem>>, vector<1x16x16xbf16>
    %1 = vector.shape_cast %0 : vector<1x16x16xbf16> to vector<16x16xbf16>
    %c0_2 = arith.constant 0 : index
    %c0_3 = arith.constant 0 : index
    %c0_4 = arith.constant 0 : index
    %2 = vector.load %arg3[%c0_2, %c0_3, %c0_4] : memref<1x16x128xbf16, #tpu.memory_space<vmem>>, vector<1x16x128xbf16>
    %3 = vector.shape_cast %2 : vector<1x16x128xbf16> to vector<16x128xbf16>
    %cst = arith.constant dense<0.000000e+00> : vector<16x128xf32>
    %4 = tpu.matmul %1, %3, %cst {dimension_numbers = #tpu.dot_dimension_numbers<[1], [0], [0], [1], [0, 0, 1, 1], [], []>} : vector<16x16xbf16>, vector<16x128xbf16>, vector<16x128xf32> -> vector<16x128xf32>
    %c0_5 = arith.constant 0 : index
    %c0_6 = arith.constant 0 : index
    %c0_7 = arith.constant 0 : index
    %5 = vector.load %arg5[%c0_5, %c0_6, %c0_7] : memref<1x16x1xf32, #tpu.memory_space<vmem>>, vector<1x16x1xf32>
    %6 = vector.shape_cast %5 : vector<1x16x1xf32> to vector<16x1xf32>
    %7 = vector.broadcast %6 : vector<16x1xf32> to vector<16x128xf32>
    %8 = arith.addf %4, %7 : vector<16x128xf32>
    %c0_8 = arith.constant 0 : index
    %c0_9 = arith.constant 0 : index
    %c0_10 = arith.constant 0 : index
    %9 = vector.load %arg6[%c0_8, %c0_9, %c0_10] : memref<1x16x128xf32, #tpu.memory_space<vmem>>, vector<1x16x128xf32>
    %10 = vector.shape_cast %9 : vector<1x16x128xf32> to vector<16x128xf32>
    %11 = vector.shape_cast %8 : vector<16x128xf32> to vector<1x16x128xf32>
    tpu.vector_store %arg6[%c0_8, %c0_9, %c0_10], %11 {strides = array<i32>} : memref<1x16x128xf32, #tpu.memory_space<vmem>>, vector<1x16x128xf32>,
    return
  }
  func.func @transform_0(%arg0: i32, %arg1: i32, %arg2: memref<2xi32, #tpu.memory_space<smem>>) -> (i32, i32, i32) {
    %c0_i32 = arith.constant 0 : i32
    %c0_i32_0 = arith.constant 0 : i32
    return %arg0, %c0_i32, %arg1 : i32, i32, i32
  }
  func.func @transform_1(%arg0: i32, %arg1: i32, %arg2: memref<2xi32, #tpu.memory_space<smem>>) -> (i32, i32, i32) {
    %0 = arith.index_cast %arg0 : i32 to index
    %1 = memref.load %arg2[%0] : memref<2xi32, #tpu.memory_space<smem>>
    %c0_i32 = arith.constant 0 : i32
    %c0_i32_0 = arith.constant 0 : i32
    %c0_i32_1 = arith.constant 0 : i32
    return %1, %c0_i32, %c0_i32_0 : i32, i32, i32
  }
  func.func @transform_2(%arg0: i32, %arg1: i32, %arg2: memref<2xi32, #tpu.memory_space<smem>>) -> (i32, i32, i32) {
    %0 = arith.index_cast %arg0 : i32 to index
    %1 = memref.load %arg2[%0] : memref<2xi32, #tpu.memory_space<smem>>
    %c0_i32 = arith.constant 0 : i32
    %c0_i32_0 = arith.constant 0 : i32
    %c0_i32_1 = arith.constant 0 : i32
    return %1, %c0_i32, %c0_i32_0 : i32, i32, i32
  }
  func.func @transform_3(%arg0: i32, %arg1: i32, %arg2: memref<2xi32, #tpu.memory_space<smem>>) -> (i32, i32, i32) {
    %c0_i32 = arith.constant 0 : i32
    %c0_i32_0 = arith.constant 0 : i32
    return %arg0, %c0_i32, %arg1 : i32, i32, i32
  }
}

</mosaic_0001>

<bundles_post_ra>
// kernel: tpu_custom_call.1
= control target key start
LH: loop header
LB: loop body
LE: loop exit
PB: predicated region body
PF: predicated region fallthrough
CT: control target
= control target key end

     0   :  { %s795_s0 = inlined_call_operand.vmem [shape: s32[2], index: 0, kind: input, shape index: {}]   ;;  %s796_s1 = inlined_call_operand.vmem [shape: bf16[2,16,128], index: 1, kind: input, shape index: {}]   ;;  %s797_s2 = inlined_call_operand.vmem [shape: bf16[3,16,16], index: 2, kind: input, shape index: {}]   ;;  %s798_s3 = inlined_call_operand.vmem [shape: f32[3,16,1], index: 3, kind: input, shape index: {}]   ;;  %s799_s4 = inlined_call_operand.hbm [shape: f32[2,16,128], index: 4, kind: output, shape index: {}]  }
   0x1   :  { %s9_s17 = sshll.u32 %s795_s0, 4  ;;  %s10_s17 = int_to_ptr.vmem [resolvable:$true] %s9_s17 }
   0x2   :  { %s543_s18 = scalar_lea.vmem %s10_s17, 16  ;;  %p548_p1 = scmp.lt.s32.totalorder %s10_s17, %s10_s17 }
   0x3   :  { %p544_p0 = scmp.ne.s32.totalorder %s10_s17, %s543_s18  ;;  %p549_p2 = scmp.lt.s32.totalorder %s543_s18, %s543_s18 }
   0x5   :  { %p550_p3 = por %p549_p2, %p548_p1 }
   0x7   :  { %p551_p4 = pnand %p550_p3, %p544_p0 }
   0x9   :  { %554 = shalt.err (!%p551_p4)  }
   0xa   :  { %s637_s19 = smov [#allocation3]  }
   0xb   :  { %12 = dma.vmem_to_smem %s10_s17, 16, %s637_s19, [#allocation2] }
   0xc   :  { %607 = dma.done.wait [#allocation2], 16 }
   0xd   :  { %608 = vsyncadd [#allocation2], 4294967280 }
   0xe   :  { %14 = sfence }
   0xf   :  { %15 = vsyncpa [#allocation5], 0 }
  0x10   :  { %17 = vsyncpa [#allocation5 + $0x1], 0  ;;  %s672_s20 = smov 0   ;;  %s674_s21 = smov 0  }
  0x11   :  { %s676_s0 = smov 0   ;;  %s678_s22 = smov 0  }
  0x12   :  { %s680_s23 = smov 0   ;;  %s682_s24 = smov 0  }
  0x13 LB: > { %s447_s25 = sadd.s32 4294967295, %s635_s24   ;;  %s448_s26 = sadd.s32 4294967294, %s635_s24   ;;  %s635_s24 = sphi %s682_s24, %s23_s24   ;;  %s631_s23 = sphi %s680_s23, %s806_s23   ;;  %s627_s22 = sphi %s678_s22, %s805_s22   ;;  %s623_s0 = sphi %s676_s0, %s804_s0   ;;  %s619_s21 = sphi %s674_s21, %s803_s21   ;;  %s615_s20 = sphi %s672_s20, %s802_s20  }
  0x14   : > { %s35_s27 = sadd.s32 1, %s631_s23  ;;  %s128_s28 = sadd.s32 1, %s623_s0 }
  0x15   : > { %p37_p5 = scmp.ge.s32.totalorder %s35_s27, 2  ;;  %p138_p6 = scmp.ne.s32.totalorder %s623_s0, %s619_s21 }
  0x16   : > { %p139_p7 = scmp.eq.s32.totalorder %s447_s25, 1  ;;  %p144_p8 = scmp.ne.s32.totalorder %s619_s21, %s615_s20 }
  0x17   : > { %s808_s27 = smov (%p37_p5, %s35_s27), 0  ;;  %p145_p10 = scmp.eq.s32.totalorder %s448_s26, 1 }
  0x18   : > { %p712_p9 = por %p139_p7, %p138_p6  ;;  %s123_s30 = ssub.s32 %s631_s23, %s808_s27 }
  0x19   : > { %p451_p11 = scmp.ge.s32.totalorder %s635_s24, 1  ;;  %p126_p12 = scmp.eq.s32.totalorder %s123_s30, 0 }
  0x1a   : > { %p719_p13 = por %p145_p10, %p144_p8  ;;  %p194_p0 = scmp.lt.s32.totalorder %s635_s24, 3 }
  0x1b   : > { %s725_s6 = scalar_select %p126_p12, %s623_s0, %s128_s28  }
  0x1c   : > { %p195_p1 = pnand %p451_p11, %p194_p0 }
  0x1d   : > { %p233_p2 = scmp.lt.s32.totalorder (!%p195_p1), %s627_s22, 1  ;;  %s241_s7 = sld [smem:[#allocation3 + %s627_s22]] (!%p195_p1)  ;;  %v638_v0 = vmov (!%p195_p1), 0.0   ;;  %vm639_vm0 = vmmov (!%p195_p1), 0   ;;  %v640_v1 = vmov (!%p195_p1), 0   ;;  %vm283_vm1 = vcmask (!%p195_p1), 130048  }
  0x1e   : > { %198 = sbr.rel (%p195_p1) target bundleno = 276 (0x114), region = 32  ;;  %473 = vmatprep.subr.bf16.mxu0 (!%p195_p1), %v638_v0  ;;  %475 = vmatprep.mubr.msk.bf16.mxu0 (!%p195_p1), %vm639_vm0, %v638_v0  ;;  %s248_s8 = sld [smem:[#allocation3 + %s627_s22]] (!%p195_p1) }
  0x1f   : > { %540 = vset.pattern.permute.xlu0 (!%p195_p1), %v640_v1  ;;  %s230_s28 = sand.u32 (!%p195_p1), 1, %s619_s21  }
  0x20   : > { %s452_s30 = sshll.u32 (!%p195_p1), %s230_s28, 4 }
  0x23   : > { %p242_p3 = scmp.lt.s32.totalorder (!%p195_p1), %s241_s7, 2 }
  0x24   : > { %p249_p4 = scmp.lt.s32.totalorder (!%p195_p1), %s248_s8, 2 }
  0x25   : > { %s234_s9 = scalar_select %p233_p2, %s627_s22, 1 }
  0x26   : > { %s810_s7 = smov (!%p242_p3, %s241_s7), 2  ;;  %s812_s8 = smov (!%p249_p4, %s248_s8), 2 }
  0x27   : > { %s467_s10 = sshll.u32 %s234_s9, 3  ;;  %s468_s14 = sshll.u32 %s810_s7, 3 }
  0x28   : > { %s240_s13 = scalar_lea.vmem %s796_s1, %s467_s10  ;;  %s246_s17 = scalar_lea.vmem %s797_s2, %s468_s14 }
  0x29   : > { %v541_v2 = vld [vmem:[%s240_s13] sm:$0xff]   ;;  %s469_s18 = sshll.u32 %s812_s8, 4  ;;  %s232_s7 = scalar_lea.vmem [#allocation4], %s452_s30 }
  0x2a   : > { %474 = vmatpush3.bf16.msra.mxu0 %v541_v2  ;;  %v542_v3 = vld [vmem:[%s246_s17] sm:$0xff]   ;;  %s253_s26 = scalar_lea.vmem %s798_s3, %s469_s18  ;;  %s345_s9 = sshll.u32 %s232_s7, 4  ;;  %s742_s9 = int_to_ptr.vmem [resolvable:$true] %s345_s9 }
  0x2b   : > { %v260_v4 = vld [vmem:[%s253_s26] sm:$0xff]  ;;  %v261_v5 = vld [vmem:[%s253_s26 + $0x8] sm:$0xff]  ;;  %s470_s10 = sshll.u32 %s627_s22, 8  ;;  %s749_s22 = scalar_lea.sflag [#allocation5], %s230_s28 }
  0x2c   : > { %264 = vperm.xlu0 %540, %v260_v4   ;;  %s747_s12 = scalar_lea.hbm %s799_s4, %s470_s10  ;;  %s555_s13 = scalar_lea.vmem %s742_s9, 256 }
  0x2d   : > { %476 = vmatmul.mubr.msk.bf16.vlgmr.msra.gmra.mrb[0].mxu0 %vm283_vm1, %v542_v3  ;;  %p556_p5 = scmp.ne.s32.totalorder %s742_s9, %s555_s13  ;;  %s641_s14 = smov [#allocation4]  }
  0x2e   : > { %s559_s15 = sshll.u32 %s641_s14, 4  ;;  %s560_s15 = int_to_ptr.vmem [resolvable:$false] %s559_s15 }
  0x2f   : > { %p557_p6 = pnand %p556_p5, %p712_p9  ;;  %s561_s16 = scalar_lea.vmem %s560_s15, 512 }
  0x30   : > { %269 = vperm.xlu0 %540, %v261_v5   ;;  %p562_p8 = scmp.lt.s32.totalorder %s742_s9, %s560_s15  ;;  %p563_p10 = scmp.lt.s32.totalorder %s561_s16, %s555_s13 }
  0x31   : > { %p558_p7 = pneg %p557_p6 }
  0x32   : > { %p564_p11 = por %p563_p10, %p562_p8 }
  0x34   : > { %p565_p12 = pnand %p564_p11, %p558_p7 }
  0xab   : > { %v265_v6 = vpop.permute.xlu0 %264 }
  0xaf   : > { %v270_v10 = vpop.permute.xlu0 %269 }
 0x100   : > { %v321_v7 = vpop.f32.mrb[0].mxu0 }
 0x101   : > { %v322_v8 = vadd.f32 %v321_v7, %v265_v6  ;;  %v477_v9 = vpop.f32.mrb[1].mxu0 }
 0x102   : > { %v324_v11 = vpop.f32.mrb[2].mxu0 }
 0x103   : > { %328 = vst [vmem:[%s232_s7] sm:$0xff] %v322_v8  ;;  %v325_v12 = vadd.f32 %v324_v11, %v270_v10  ;;  %v478_v13 = vpop.f32.mrb[3].mxu0 }
 0x105   : > { %329 = vst [vmem:[%s232_s7 + $0x8] sm:$0xff] %v325_v12 }
 0x106   : > { %568 = shalt.err (!%p565_p12)
}
 0x107   : > { %s569_s17 = scalar_lea.hbm %s747_s12, 256  ;;  %s573_s25 = scalar_lea.hbm %s799_s4, 512 }
 0x108   : > { %p570_p0 = scmp.ne.s32.totalorder %s747_s12, %s569_s17  ;;  %p574_p3 = scmp.lt.u32.totalorder %s747_s12, %s799_s4 }
 0x109   : > { %p575_p4 = scmp.lt.u32.totalorder %s573_s25, %s569_s17  ;;  %p577_p6 = scmp.lt.u32.totalorder %s569_s17, %s747_s12 }
 0x10a   : > { %p571_p1 = pnand %p570_p0, %p712_p9 }
 0x10b   : > { %p576_p5 = por %p575_p4, %p574_p3 }
 0x10c   : > { %p572_p2 = pneg %p571_p1 }
 0x10d   : > { %p578_p7 = por %p577_p6, %p576_p5 }
 0x10f   : > { %p579_p8 = pnand %p578_p7, %p572_p2 }
 0x111   : > { %582 = shalt.err (!%p579_p8)
}
 0x112   : > { %s642_s30 = smov 128   ;;  %s643_s7 = smov 8  }
 0x113   : > { %479 = dma.vmem_to_hbm [thread:$0]  (%p712_p9), %s742_s9, 256, %s747_s12, %s749_s22, %s642_s30, %s642_s30, %s643_s7  }
 0x114 PF: > { %p485_p10 = scmp.ge.s32.totalorder %s635_s24, 2  ;;  %s360_s10 = sand.u32 1, %s615_s20  }
 0x115   : > { %s361_s8 = scalar_lea.sflag [#allocation5], %s360_s10 }
 0x116   : > { %p482_p11 = pnand %p485_p10, %p719_p13 }
 0x118   : > { %610 = dma.done.wait (!%p482_p11), %s361_s8, 256  }
 0x119   : > { %612 = vsyncadd (!%p482_p11), %s361_s8, 4294967040  ;;  %s23_s24 = sadd.s32 1, %s635_s24   ;;  %s802_s20 = smov %s619_s21 }
 0x11a   : > { %p20_p12 = scmp.ge.s32.totalorder %s23_s24, 4   ;;  %s803_s21 = smov %s623_s0 }
 0x11b   : > { %s804_s0 = smov %s725_s6  ;;  %s805_s22 = smov %s631_s23 }
 0x11c   : > { %s806_s23 = smov %s808_s27  ;;  %22 = sbr.rel (!%p20_p12) target bundleno = 19 (0x13), region = 73 }
 0x123   :  { %366 = vsyncpa [#allocation5], 1 }
 0x124   :  { %368 = vsyncpa [#allocation5 + $0x1], 1 }

</bundles_post_ra>
